<compile_context>
chip_gen: v6e
topology: v6e:2x2x1
jax: 0.10.0
libtpu: 0.0.40
codegen_flags: <defaults>
</compile_context>

<pallas_src>
import jax
import jax.numpy as jnp
from jax.experimental import pallas as pl
from jax.experimental.pallas import tpu as pltpu


def _policy_argmax_kernel(x2_ref, x1_ref, w2_ref, w1_ref, b_ref, idx_ref):
    """x2:[B,F2] x1:[B,F1] w2:[F2,A] w1:[F1,A] b:[1,A] f32 -> idx:[1,1] i32 (SMEM).

    Computes the flat (row-major) argmax of softmax(concat(x2,x1) @ W + b).
    """
    # concat fused as two partial contractions (MXU; tiny tiles, latency only)
    logits = jnp.dot(x2_ref[...], w2_ref[...], preferred_element_type=jnp.float32)
    logits = logits + jnp.dot(x1_ref[...], w1_ref[...],
                              preferred_element_type=jnp.float32)
    logits = logits + b_ref[...]                      # broadcast bias over batch

    B, A = logits.shape

    # log-softmax score (monotone in probs; keeps the per-row logsumexp term,
    # so the cross-row ordering matches argmax over probs).  No divide.
    m = jnp.max(logits, axis=-1, keepdims=True)                     # (B,1)
    s = jnp.sum(jnp.exp(logits - m), axis=-1, keepdims=True)        # (B,1)
    score = logits - m - jnp.log(s)                                  # (B,A)

    # per-row argmax column, ties broken toward the smallest column
    col = jax.lax.broadcasted_iota(jnp.int32, (B, A), 1)
    row_max = jnp.max(score, axis=-1, keepdims=True)                 # (B,1)
    row_col = jnp.min(jnp.where(score == row_max, col, jnp.int32(A)),
                      axis=-1, keepdims=True)                        # (B,1) i32

    # cross-row combine: smallest flat index among rows hitting the global max
    row_ids = jax.lax.broadcasted_iota(jnp.int32, (B, 1), 0)
    flat = row_ids * jnp.int32(A) + row_col                          # (B,1) i32
    gmax = jnp.max(row_max, keepdims=True)                           # (1,1)
    best = jnp.min(jnp.where(row_max == gmax, flat, jnp.int32(B * A)))
    idx_ref[0, 0] = best                                             # scalar -> SMEM


def policy_argmax(obs2, obs1, w2, w1, b):
    """matmul + log-softmax + global argmax in a single-block Pallas call."""
    B = obs1.shape[0]
    F2, A = w2.shape
    F1 = w1.shape[0]
    bytes_in = 4 * (B * (F1 + F2) + (F1 + F2) * A + A)
    cost = pl.CostEstimate(
        flops=2 * B * (F1 + F2) * A + 8 * B * A,
        transcendentals=B * (A + 1),          # exp per element + log per row
        bytes_accessed=bytes_in + 4,
    )
    # TODO(synk): for large batch, add a 1-D grid over B ("arbitrary") with a
    # carried (best_score, best_flat_idx) SMEM accumulator to restore
    # double-buffered pipelining; unnecessary at B=2.
    return pl.pallas_call(
        _policy_argmax_kernel,
        out_shape=jax.ShapeDtypeStruct((1, 1), jnp.int32),
        in_specs=[
            pl.BlockSpec(memory_space=pltpu.VMEM),   # obs2 [B, F2]
            pl.BlockSpec(memory_space=pltpu.VMEM),   # obs1 [B, F1]
            pl.BlockSpec(memory_space=pltpu.VMEM),   # w2   [F2, A]
            pl.BlockSpec(memory_space=pltpu.VMEM),   # w1   [F1, A]
            pl.BlockSpec(memory_space=pltpu.VMEM),   # b    [1, A]
        ],
        out_specs=pl.BlockSpec(memory_space=pltpu.SMEM),  # scalar index in SMEM
        cost_estimate=cost,
    )(obs2, obs1, w2, w1, b)


class ModelWrapperPallas:
    """JAX/Pallas re-implementation of common.saver.ModelWrapper."""

    def __init__(self, obs1_features, obs2_features, num_actions, key):
        kw, kb = jax.random.split(key)
        in_features = obs1_features + obs2_features
        # deterministic synthetic "model" parameters
        w = (jax.random.normal(kw, (in_features, num_actions), jnp.float32)
             * (1.0 / jnp.sqrt(jnp.float32(in_features))))
        # concat order is (obs2, obs1): first obs2_features rows of W act on obs2
        self.w2 = w[:obs2_features]
        self.w1 = w[obs2_features:]
        self.b = jax.random.normal(kb, (1, num_actions), jnp.float32) * 0.01

        # non-trainable export parameters (identical to the torch module)
        self.memory_size_vector = jnp.array([0.0], dtype=jnp.float32)
        self.version_number = jnp.array([3.0], dtype=jnp.float32)
        self.discrete_act_size_vector = jnp.array([2.0], dtype=jnp.float32)

    def __call__(self, obs1, obs2, _action_masks=None):
        # torch.cat((obs2, obs1), dim=1) is fused inside the kernel (split W).
        out_idx = policy_argmax(obs2.astype(jnp.float32),
                                obs1.astype(jnp.float32),
                                self.w2, self.w1, self.b)        # (1,1) int32
        out = out_idx.reshape((-1, 1, 1))                        # (1,1,1)
        # TODO(synk): torch.argmax returns int64; TPU kernel emits an int32 index.
        return (self.version_number,
                self.memory_size_vector,
                out,
                self.discrete_act_size_vector)


if __name__ == "__main__":
    key = jax.random.PRNGKey(0)
    k1, k2, kp = jax.random.split(key, 3)

    B, F1, F2, A = 2, 16, 16, 8          # small synthetic shapes
    obs1 = jax.random.normal(k1, (B, F1), jnp.float32)
    obs2 = jax.random.normal(k2, (B, F2), jnp.float32)

    wrapper = ModelWrapperPallas(obs1_features=F1, obs2_features=F2,
                                 num_actions=A, key=kp)
    version, mem, action_idx, act_size = wrapper(obs1, obs2)
    jax.block_until_ready(action_idx)

    # sanity check against plain-JAX reference (matches the torch semantics)
    w_full = jnp.concatenate([wrapper.w2, wrapper.w1], axis=0)
    inp = jnp.concatenate([obs2, obs1], axis=1)
    logits = inp @ w_full + wrapper.b
    probs = jax.nn.softmax(logits, axis=-1)
    ref_idx = jnp.argmax(probs.reshape(-1)).astype(jnp.int32)
    assert int(action_idx.reshape(())) == int(ref_idx), (action_idx, ref_idx)
    assert action_idx.shape == (1, 1, 1)
    assert float(version[0]) == 3.0 and float(mem[0]) == 0.0 and float(act_size[0]) == 2.0

    print("KERNEL_OK")
</pallas_src>

<mosaic_0001>
module attributes {stable_mosaic.version = 11 : i64} {
  func.func @_policy_argmax_kernel(%arg0: memref<2x16xf32, #tpu.memory_space<vmem>>, %arg1: memref<2x16xf32, #tpu.memory_space<vmem>>, %arg2: memref<16x8xf32, #tpu.memory_space<vmem>>, %arg3: memref<16x8xf32, #tpu.memory_space<vmem>>, %arg4: memref<1x8xf32, #tpu.memory_space<vmem>>, %arg5: memref<1x1xi32, #tpu.memory_space<smem>>) attributes {dimension_semantics = [], scalar_prefetch = 0 : i64, scratch_operands = 0 : i64, tpu.core_type = #tpu.core_type<tc>} {
    %c0 = arith.constant 0 : index
    %c0_0 = arith.constant 0 : index
    %0 = vector.load %arg0[%c0, %c0_0] : memref<2x16xf32, #tpu.memory_space<vmem>>, vector<2x16xf32>
    %c0_1 = arith.constant 0 : index
    %c0_2 = arith.constant 0 : index
    %1 = vector.load %arg2[%c0_1, %c0_2] : memref<16x8xf32, #tpu.memory_space<vmem>>, vector<16x8xf32>
    %cst = arith.constant dense<0.000000e+00> : vector<2x8xf32>
    %2 = tpu.matmul %0, %1, %cst {dimension_numbers = #tpu.dot_dimension_numbers<[1], [0], [0], [1], [0, 0, 1, 1], [], []>} : vector<2x16xf32>, vector<16x8xf32>, vector<2x8xf32> -> vector<2x8xf32>
    %c0_3 = arith.constant 0 : index
    %c0_4 = arith.constant 0 : index
    %3 = vector.load %arg1[%c0_3, %c0_4] : memref<2x16xf32, #tpu.memory_space<vmem>>, vector<2x16xf32>
    %c0_5 = arith.constant 0 : index
    %c0_6 = arith.constant 0 : index
    %4 = vector.load %arg3[%c0_5, %c0_6] : memref<16x8xf32, #tpu.memory_space<vmem>>, vector<16x8xf32>
    %cst_7 = arith.constant dense<0.000000e+00> : vector<2x8xf32>
    %5 = tpu.matmul %3, %4, %cst_7 {dimension_numbers = #tpu.dot_dimension_numbers<[1], [0], [0], [1], [0, 0, 1, 1], [], []>} : vector<2x16xf32>, vector<16x8xf32>, vector<2x8xf32> -> vector<2x8xf32>
    %6 = arith.addf %2, %5 : vector<2x8xf32>
    %c0_8 = arith.constant 0 : index
    %c0_9 = arith.constant 0 : index
    %7 = vector.load %arg4[%c0_8, %c0_9] : memref<1x8xf32, #tpu.memory_space<vmem>>, vector<1x8xf32>
    %8 = vector.broadcast %7 : vector<1x8xf32> to vector<2x8xf32>
    %9 = arith.addf %6, %8 : vector<2x8xf32>
    %cst_10 = arith.constant dense<0xFF800000> : vector<2xf32>
    %10 = vector.multi_reduction <maximumf>, %9, %cst_10 [1] : vector<2x8xf32> to vector<2xf32>
    %11 = vector.shape_cast %10 : vector<2xf32> to vector<2x1xf32>
    %12 = vector.broadcast %11 : vector<2x1xf32> to vector<2x8xf32>
    %13 = arith.subf %9, %12 : vector<2x8xf32>
    %14 = math.exp %13 : vector<2x8xf32>
    %cst_11 = arith.constant dense<0.000000e+00> : vector<2xf32>
    %15 = vector.multi_reduction <add>, %14, %cst_11 [1] : vector<2x8xf32> to vector<2xf32>
    %16 = vector.shape_cast %15 : vector<2xf32> to vector<2x1xf32>
    %17 = vector.broadcast %11 : vector<2x1xf32> to vector<2x8xf32>
    %18 = arith.subf %9, %17 : vector<2x8xf32>
    %19 = math.log %16 : vector<2x1xf32>
    %20 = vector.broadcast %19 : vector<2x1xf32> to vector<2x8xf32>
    %21 = arith.subf %18, %20 : vector<2x8xf32>
    %22 = tpu.iota {dimensions = array<i32: 1>} : vector<2x8xi32>
    %cst_12 = arith.constant dense<0xFF800000> : vector<2xf32>
    %23 = vector.multi_reduction <maximumf>, %21, %cst_12 [1] : vector<2x8xf32> to vector<2xf32>
    %24 = vector.shape_cast %23 : vector<2xf32> to vector<2x1xf32>
    %25 = vector.broadcast %24 : vector<2x1xf32> to vector<2x8xf32>
    %26 = arith.cmpf oeq, %21, %25 : vector<2x8xf32>
    %c8_i32 = arith.constant 8 : i32
    %27 = vector.broadcast %c8_i32 : i32 to vector<2x8xi32>
    %28 = arith.select %26, %22, %27 : vector<2x8xi1>, vector<2x8xi32>
    %cst_13 = arith.constant dense<2147483647> : vector<2xi32>
    %29 = vector.multi_reduction <minsi>, %28, %cst_13 [1] : vector<2x8xi32> to vector<2xi32>
    %30 = vector.shape_cast %29 : vector<2xi32> to vector<2x1xi32>
    %31 = tpu.iota {dimensions = array<i32: 0>} : vector<2x1xi32>
    %c8_i32_14 = arith.constant 8 : i32
    %32 = vector.broadcast %c8_i32_14 : i32 to vector<2x1xi32>
    %33 = arith.muli %31, %32 : vector<2x1xi32>
    %34 = arith.addi %33, %30 : vector<2x1xi32>
    %35 = vector.shape_cast %24 : vector<2x1xf32> to vector<1x2x1xf32>
    %cst_15 = arith.constant dense<0xFF800000> : vector<1xf32>
    %36 = vector.multi_reduction <maximumf>, %35, %cst_15 [1, 2] : vector<1x2x1xf32> to vector<1xf32>
    %37 = vector.shape_cast %36 : vector<1xf32> to vector<1x1x1xf32>
    %38 = vector.extract %37[0, 0, 0] : f32 from vector<1x1x1xf32>
    %39 = vector.broadcast %38 : f32 to vector<1x1xf32>
    %40 = vector.broadcast %39 : vector<1x1xf32> to vector<2x1xf32>
    %41 = arith.cmpf oeq, %24, %40 : vector<2x1xf32>
    %c16_i32 = arith.constant 16 : i32
    %42 = vector.broadcast %c16_i32 : i32 to vector<2x1xi32>
    %43 = arith.select %41, %34, %42 : vector<2x1xi1>, vector<2x1xi32>
    %44 = vector.shape_cast %43 : vector<2x1xi32> to vector<1x2x1xi32>
    %cst_16 = arith.constant dense<2147483647> : vector<1xi32>
    %45 = vector.multi_reduction <minsi>, %44, %cst_16 [1, 2] : vector<1x2x1xi32> to vector<1xi32>
    %46 = vector.shape_cast %45 : vector<1xi32> to vector<1x1x1xi32>
    %47 = vector.extract %46[0, 0, 0] : i32 from vector<1x1x1xi32>
    %c0_17 = arith.constant 0 : index
    %c0_18 = arith.constant 0 : index
    %48 = memref.load %arg5[%c0_17, %c0_18] : memref<1x1xi32, #tpu.memory_space<smem>>
    memref.store %47, %arg5[%c0_17, %c0_18] : memref<1x1xi32, #tpu.memory_space<smem>>
    return
  }
}

</mosaic_0001>

<bundles_post_ra>
// kernel: tpu_custom_call.1
= control target key start
LH: loop header
LB: loop body
LE: loop exit
PB: predicated region body
PF: predicated region fallthrough
CT: control target
= control target key end

     0   :  { %v303_v2 = vmov 0.0   ;;  %s366_s0 = inlined_call_operand.vmem [shape: f32[2,16], index: 0, kind: input, shape index: {}]   ;;  %s367_s1 = inlined_call_operand.vmem [shape: f32[2,16], index: 1, kind: input, shape index: {}]   ;;  %s368_s2 = inlined_call_operand.vmem [shape: f32[16,8], index: 2, kind: input, shape index: {}]   ;;  %s369_s3 = inlined_call_operand.vmem [shape: f32[16,8], index: 3, kind: input, shape index: {}]   ;;  %s370_s4 = inlined_call_operand.vmem [shape: f32[1,8], index: 4, kind: input, shape index: {}]   ;;  %s371_s5 = inlined_call_operand.hbm [shape: s32[1,1], index: 5, kind: output, shape index: {}]  }
   0x1   :  { %v26_v0 = vld [vmem:[%s369_s3 + $0x8] sm:$0xff]  ;;  %268 = vmatprep.subr.mxu0 %v303_v2  ;;  %275 = vmatprep.subr.mxu1 %v303_v2  ;;  %v25_v3 = vld [vmem:[%s369_s3] sm:$0xff] }
   0x2   :  { %v23_v1 = vld [vmem:[%s368_s2 + $0x8] sm:$0xff]  ;;  %269 = vmatpush3.msra.mxu0 %v26_v0  ;;  %v22_v4 = vld [vmem:[%s368_s2] sm:$0xff] }
   0x3   :  { %276 = vmatpush3.msra.mxu1 %v23_v1 }
   0x4   :  { %10 = vsyncpa [#allocation3], 0  ;;  %270 = vmatprep.subr.mxu0 %v303_v2  ;;  %277 = vmatprep.subr.mxu1 %v303_v2  ;;  %v24_v5 = vld [vmem:[%s367_s1] sm:$0x3]  ;;  %vm27_vm0 = vcmask 130048   ;;  %vm304_vm1 = vmmov 0   ;;  %v195_v25 = vlaneseq }
   0x5   :  { %v21_v6 = vld [vmem:[%s366_s0] sm:$0x3]  ;;  %271 = vmatpush3.msra.mxu0 %v25_v3  ;;  %272 = vmatprep.mubr.msk.f32.mxu0 %vm304_vm1, %v303_v2  ;;  %vm182_vm2 = vcmask 58368   ;;  %vm221_vm3 = vcmask 1041408  }
   0x6   :  { %278 = vmatpush3.msra.mxu1 %v22_v4  ;;  %279 = vmatprep.mubr.msk.f32.mxu1 %vm304_vm1, %v303_v2  ;;  %v261_v9 = vld [vmem:[%s370_s4] ss:$0 sm:$0xff]  ;;  %v196_v26 = vand.u32 127, %v195_v25  ;;  %v218_v44 = vshrl.u32 %v195_v25, 7  ;;  %s305_s4 = smov [#allocation2]  }
   0x7   :  { %273 = vmatmul.mubr.msk.f32.vlgmr.msra.gmra.mxu0 %vm27_vm0, %v24_v5  ;;  %280 = vmatmul.mubr.msk.f32.vlgmr.msra.gmra.mxu1 %vm27_vm0, %v21_v6 }
   0x8   :  { %v219_v47 = vmul.u32 8, %v218_v44 }
  0xc7   :  { %v97_v7 = vpop.f32.mrf.mxu0  ;;  %v170_v8 = vpop.f32.mrf.mxu1 }
  0xc8   :  { %v171_v10 = vadd.f32 %v170_v8, %v97_v7 }
  0xc9   :  { %v274_v11 = vpop.f32.mrf.mxu0  ;;  %v281_v12 = vpop.f32.mrf.mxu1 }
  0xca   :  { %v181_v13 = vadd.f32 %v261_v9, %v171_v10 }
  0xcc   :  { %v183_v14 = vsel %vm182_vm2, %v181_v13, -inf }
  0xcd   :  { %184 = vmax.xlane.f32.xlu0 %v183_v14 }
 0x156   :  { %v185_v15 = vpop.xlane.xlu0 %184 }
 0x157   :  { %v186_v16 = vsub.f32 %v181_v13, %v185_v15 }
 0x159   :  { %v187_v17 = vmul.f32 1.442695, %v186_v16 }
 0x15b   :  { %289 = vpow2.f32 %v187_v17 }
 0x168   :  { %v290_v18 = vpop.eup %289 }
 0x169   :  { %v189_v19 = vsel %vm182_vm2, %v290_v18, 0.0 }
 0x16a   :  { %190 = vadd.xlane.f32.xlu0 %v189_v19 }
 0x1f3   :  { %v191_v20 = vpop.xlane.xlu0 %190 }
 0x1f4   :  { %291 = vlog2.f32 %v191_v20 }
 0x201   :  { %v292_v21 = vpop.eup %291 }
 0x202   :  { %v193_v22 = vmul.f32 0.6931472, %v292_v21 }
 0x204   :  { %v194_v23 = vsub.f32 %v186_v16, %v193_v22 }
 0x206   :  { %v197_v24 = vsel %vm182_vm2, %v194_v23, -inf }
 0x207   :  { %198 = vmax.xlane.f32.xlu1 %v197_v24 }
 0x290   :  { %v199_v27 = vpop.xlane.xlu1 %198 }
 0x291   :  { %vm200_vm4 = vcmp.eq.f32.partialorder %v194_v23, %v199_v27  ;;  %v222_v28 = vsel %vm221_vm3, %v199_v27, -inf }
 0x292   :  { %v223_v29 = vrot.slane %v222_v28, 4  ;;  %v201_v30 = vsel %vm200_vm4, %v196_v26, 8 }
 0x293   :  { %v202_v31 = vsel %vm182_vm2, %v201_v30, 2147483647 }
 0x294   :  { %v204_v32 = vshra.s32 %v202_v31, 16  ;;  %v224_v33 = vmax.f32 %v222_v28, %v223_v29  ;;  %v203_v39 = vand.u32 65535, %v202_v31 }
 0x296   :  { %v206_v34 = vcvt.s32.f32 %v204_v32  ;;  %v225_v35 = vrot.slane %v224_v33, 2  ;;  %v205_v41 = vcvt.s32.f32 %v203_v39 }
 0x298   :  { %207 = vmin.xlane.f32.xlu1 %v206_v34  ;;  %v226_v36 = vmax.f32 %v224_v33, %v225_v35 }
 0x29a   :  { %v227_v37 = vrot.slane %v226_v36, 1 }
 0x29c   :  { %v228_v38 = vmax.f32 %v226_v36, %v227_v37 }
 0x29e   :  { %282 = vpush %v228_v38 }
 0x2cf   :  { %s283_s0 = spop %282 }
 0x2d0   :  { %v230_v49 = vstv %s283_s0 }
 0x2d1   :  { %vm231_vm6 = vcmp.eq.f32.partialorder %v199_v27, %v230_v49 }
 0x321   :  { %v208_v40 = vpop.xlane.xlu1 %207 }
 0x322   :  { %vm209_vm5 = vcmp.eq.f32.partialorder %v206_v34, %v208_v40  ;;  %v214_v43 = vcvt.f32.s32 %v208_v40 }
 0x323   :  { %v210_v42 = vsel %vm209_vm5, %v205_v41, inf }
 0x324   :  { %211 = vmin.xlane.f32.xlu0 %v210_v42  ;;  %v215_v46 = vshll.u32 %v214_v43, 16 }
 0x3ad   :  { %v212_v45 = vpop.xlane.xlu0 %211 }
 0x3ae   :  { %v213_v48 = vcvt.f32.s32 %v212_v45 }
 0x3b0   :  { %v216_v50 = vadd.s32 %v215_v46, %v213_v48 }
 0x3b2   :  { %v220_v51 = vadd.s32 %v219_v47, %v216_v50 }
 0x3b4   :  { %v232_v52 = vsel %vm231_vm6, %v220_v51, 16 }
 0x3b5   :  { %v233_v53 = vsel %vm221_vm3, %v232_v52, 2147483647 }
 0x3b6   :  { %v234_v54 = vrot.slane %v233_v53, 4 }
 0x3b8   :  { %vm235_vm7 = vcmp.lt.s32.totalorder %v233_v53, %v234_v54 }
 0x3b9   :  { %v236_v55 = vsel %vm235_vm7, %v233_v53, %v234_v54 }
 0x3ba   :  { %v237_v56 = vrot.slane %v236_v55, 2 }
 0x3bc   :  { %vm238_vm8 = vcmp.lt.s32.totalorder %v236_v55, %v237_v56 }
 0x3bd   :  { %v239_v57 = vsel %vm238_vm8, %v236_v55, %v237_v56 }
 0x3be   :  { %v240_v58 = vrot.slane %v239_v57, 1 }
 0x3c0   :  { %vm241_vm9 = vcmp.lt.s32.totalorder %v239_v57, %v240_v58 }
 0x3c1   :  { %v242_v59 = vsel %vm241_vm9, %v239_v57, %v240_v58 }
 0x3c2   :  { %284 = vpush %v242_v59 }
 0x3f3   :  { %s285_s1 = spop %284 }
 0x3f4   :  { %245 = sst [smem:[#allocation2]] %s285_s1 }
 0x3f5   :  { %253 = dma.smem_to_hbm %s305_s4, 16, %s371_s5, [#allocation3]  }
 0x3f6   :  { %301 = dma.done.wait [#allocation3], 16  }
 0x3f7   :  { %302 = vsyncadd [#allocation3], 4294967280 }
 0x3f8   :  { %257 = sfence }
 0x3f9   :  { %258 = vsyncpa [#allocation3], 1 }

</bundles_post_ra>
